<compile_context>
chip_gen: v6e
topology: v6e:2x2x1
jax: 0.10.0
libtpu: 0.0.40
codegen_flags: <defaults>
</compile_context>

<pallas_src>
import functools

import jax
import jax.numpy as jnp
from jax import lax
from jax.experimental import pallas as pl
from jax.experimental.pallas import tpu as pltpu

_INV_SQRT2 = 0.7071067811865476


def _linear_block_kernel(x_ref, w_ref, b_ref, o_ref, acc_ref, *, activation: str):
    """One (tm, tn) output tile, accumulated over the K grid axis.

    x_ref: (tm, tk)   input tile
    w_ref: (tn, tk)   weight tile in torch (out, in) layout -> contract dim 1
    b_ref: (1, tn)    bias tile
    o_ref: (tm, tn)   output tile (written on the last K step only)
    acc_ref: (tm, tn) f32 accumulator scratch (persists across K steps)
    """
    k = pl.program_id(2)

    @pl.when(k == 0)
    def _init():
        acc_ref[...] = jnp.zeros_like(acc_ref)

    # MXU matmul in the input dtype, f32 accumulation. Contracting dim 1 of
    # both operands avoids any transpose of the (out, in) weight.
    acc_ref[...] += lax.dot_general(
        x_ref[...], w_ref[...],
        dimension_numbers=(((1,), (1,)), ((), ())),
        preferred_element_type=jnp.float32,
    )

    @pl.when(k == pl.num_programs(2) - 1)
    def _finalize():
        y = acc_ref[...] + b_ref[...].astype(jnp.float32)
        if activation == "gelu":
            # torch.nn.GELU() default = exact (erf) formulation.
            y = 0.5 * y * (1.0 + lax.erf(y * jnp.float32(_INV_SQRT2)))
        elif activation == "relu":
            y = jnp.maximum(y, 0.0)
        else:
            raise ValueError(f"Invalid activation function: {activation}")
        o_ref[...] = y.astype(o_ref.dtype)


def _round_up(a: int, b: int) -> int:
    return (a + b - 1) // b * b


def linear_block(x: jax.Array, weight: jax.Array, bias: jax.Array,
                 activation: str = "gelu",
                 *, tm: int | None = None, tn: int | None = None,
                 tk: int | None = None) -> jax.Array:
    """activation(x @ weight.T + bias), weight in torch (out_features, in_features) layout."""
    if activation not in ("gelu", "relu"):
        raise ValueError(f"Invalid activation function: {activation}")

    m, k = x.shape
    n, k_w = weight.shape
    assert k == k_w, (k, k_w)
    assert bias.shape == (n,), bias.shape

    # Tile sizes: lane-dense (multiples of 128) on N/K, sublane-aligned on M.
    # Caps chosen to fit scoped VMEM on every generation (v5e/v6e/v7x).
    tm = tm or min(256, _round_up(m, 8))
    tn = tn or min(512, _round_up(n, 128))
    tk = tk or min(512, _round_up(k, 128))

    mp = _round_up(m, tm)
    np_ = _round_up(n, tn)
    kp = _round_up(k, tk)

    # Zero-pad to tile-aligned shapes (no-op when shapes already align).
    x_p = x if (mp == m and kp == k) else jnp.pad(x, ((0, mp - m), (0, kp - k)))
    w_p = weight if (np_ == n and kp == k) else jnp.pad(weight, ((0, np_ - n), (0, kp - k)))
    b_p = bias if np_ == n else jnp.pad(bias, (0, np_ - n))
    b2d = b_p.reshape(1, np_)

    grid = (mp // tm, np_ // tn, kp // tk)
    kernel = functools.partial(_linear_block_kernel, activation=activation)

    itemsize = x.dtype.itemsize
    cost = pl.CostEstimate(
        flops=2 * mp * np_ * kp,
        transcendentals=mp * np_ if activation == "gelu" else 0,
        bytes_accessed=(mp * kp + np_ * kp + np_) * itemsize + mp * np_ * itemsize,
    )

    out_padded = pl.pallas_call(
        kernel,
        out_shape=jax.ShapeDtypeStruct((mp, np_), x.dtype),
        grid_spec=pltpu.PrefetchScalarGridSpec(
            num_scalar_prefetch=0,
            grid=grid,
            in_specs=[
                pl.BlockSpec((tm, tk), lambda i, j, kk: (i, kk)),   # x tile
                pl.BlockSpec((tn, tk), lambda i, j, kk: (j, kk)),   # weight tile (out, in)
                pl.BlockSpec((1, tn), lambda i, j, kk: (0, j)),     # bias tile
            ],
            out_specs=pl.BlockSpec((tm, tn), lambda i, j, kk: (i, j)),
            scratch_shapes=[pltpu.VMEM((tm, tn), jnp.float32)],
        ),
        compiler_params=pltpu.CompilerParams(
            dimension_semantics=("parallel", "parallel", "arbitrary")),
        cost_estimate=cost,
    )(x_p, w_p, b2d)

    if mp == m and np_ == n:
        return out_padded
    return out_padded[:m, :n]


if __name__ == "__main__":
    batch, in_features, out_features = 8, 32, 16

    key = jax.random.PRNGKey(0)
    kx, kw, kb = jax.random.split(key, 3)

    x = jax.random.normal(kx, (batch, in_features), dtype=jnp.float32)
    # Deterministic "LazyLinear" params: (out_features, in_features) and (out_features,).
    bound = 1.0 / jnp.sqrt(jnp.float32(in_features))
    weight = jax.random.uniform(kw, (out_features, in_features),
                                dtype=jnp.float32, minval=-bound, maxval=bound)
    bias = jax.random.uniform(kb, (out_features,),
                              dtype=jnp.float32, minval=-bound, maxval=bound)

    # GELU path (torch.nn.GELU default = exact erf).
    out_gelu = jax.block_until_ready(linear_block(x, weight, bias, activation="gelu"))
    ref = x @ weight.T + bias
    ref_gelu = 0.5 * ref * (1.0 + lax.erf(ref / jnp.sqrt(2.0)))
    assert out_gelu.shape == (batch, out_features)
    assert jnp.allclose(out_gelu, ref_gelu, atol=1e-5, rtol=1e-5), "gelu mismatch vs reference"

    # ReLU path.
    out_relu = jax.block_until_ready(linear_block(x, weight, bias, activation="relu"))
    ref_relu = jnp.maximum(ref, 0.0)
    assert jnp.allclose(out_relu, ref_relu, atol=1e-5, rtol=1e-5), "relu mismatch vs reference"

    print("KERNEL_OK")
</pallas_src>

<mosaic_0001>
module attributes {stable_mosaic.version = 11 : i64} {
  func.func @_linear_block_kernel(%arg0: i32, %arg1: i32, %arg2: i32, %arg3: memref<8x128xf32, #tpu.memory_space<vmem>>, %arg4: memref<128x128xf32, #tpu.memory_space<vmem>>, %arg5: memref<1x128xf32, #tpu.memory_space<vmem>>, %arg6: memref<8x128xf32, #tpu.memory_space<vmem>>, %arg7: memref<8x128xf32, #tpu.memory_space<vmem>>) attributes {dimension_semantics = [#tpu.dimension_semantics<parallel>, #tpu.dimension_semantics<parallel>, #tpu.dimension_semantics<arbitrary>], iteration_bounds = array<i64: 1, 1, 1>, scalar_prefetch = 0 : i64, scratch_operands = 1 : i64, tpu.core_type = #tpu.core_type<tc>, window_params = [{transform_indices = @transform_0, window_bounds = array<i64: 8, 128>}, {transform_indices = @transform_1, window_bounds = array<i64: 128, 128>}, {transform_indices = @transform_2, window_bounds = array<i64: 1, 128>}, {transform_indices = @transform_3, window_bounds = array<i64: 8, 128>}]} {
    %c0_i32 = arith.constant 0 : i32
    %0 = arith.cmpi eq, %arg2, %c0_i32 : i32
    %1 = arith.extui %0 : i1 to i32
    %c0_i32_0 = arith.constant 0 : i32
    %2 = arith.cmpi ne, %1, %c0_i32_0 : i32
    scf.if %2 {
      %cst_10 = arith.constant 0.000000e+00 : f32
      %12 = vector.broadcast %cst_10 : f32 to vector<8x128xf32>
      %c0_11 = arith.constant 0 : index
      %c0_12 = arith.constant 0 : index
      %13 = vector.load %arg7[%c0_11, %c0_12] : memref<8x128xf32, #tpu.memory_space<vmem>>, vector<8x128xf32>
      tpu.vector_store %arg7[%c0_11, %c0_12], %12 {strides = array<i32>} : memref<8x128xf32, #tpu.memory_space<vmem>>, vector<8x128xf32>,
    } else {
    }
    %c0 = arith.constant 0 : index
    %c0_1 = arith.constant 0 : index
    %3 = vector.load %arg7[%c0, %c0_1] : memref<8x128xf32, #tpu.memory_space<vmem>>, vector<8x128xf32>
    %c0_2 = arith.constant 0 : index
    %c0_3 = arith.constant 0 : index
    %4 = vector.load %arg3[%c0_2, %c0_3] : memref<8x128xf32, #tpu.memory_space<vmem>>, vector<8x128xf32>
    %c0_4 = arith.constant 0 : index
    %c0_5 = arith.constant 0 : index
    %5 = vector.load %arg4[%c0_4, %c0_5] : memref<128x128xf32, #tpu.memory_space<vmem>>, vector<128x128xf32>
    %cst = arith.constant dense<0.000000e+00> : vector<8x128xf32>
    %6 = tpu.matmul %4, %5, %cst {dimension_numbers = #tpu.dot_dimension_numbers<[1], [1], [0], [0], [0, 0, 1, 0], [], []>} : vector<8x128xf32>, vector<128x128xf32>, vector<8x128xf32> -> vector<8x128xf32>
    %7 = arith.addf %3, %6 : vector<8x128xf32>
    %c0_6 = arith.constant 0 : index
    %c0_7 = arith.constant 0 : index
    %8 = vector.load %arg7[%c0_6, %c0_7] : memref<8x128xf32, #tpu.memory_space<vmem>>, vector<8x128xf32>
    tpu.vector_store %arg7[%c0_6, %c0_7], %7 {strides = array<i32>} : memref<8x128xf32, #tpu.memory_space<vmem>>, vector<8x128xf32>,
    %c0_i32_8 = arith.constant 0 : i32
    %9 = arith.cmpi eq, %arg2, %c0_i32_8 : i32
    %10 = arith.extui %9 : i1 to i32
    %c0_i32_9 = arith.constant 0 : i32
    %11 = arith.cmpi ne, %10, %c0_i32_9 : i32
    scf.if %11 {
      %c0_10 = arith.constant 0 : index
      %c0_11 = arith.constant 0 : index
      %12 = vector.load %arg7[%c0_10, %c0_11] : memref<8x128xf32, #tpu.memory_space<vmem>>, vector<8x128xf32>
      %c0_12 = arith.constant 0 : index
      %c0_13 = arith.constant 0 : index
      %13 = vector.load %arg5[%c0_12, %c0_13] : memref<1x128xf32, #tpu.memory_space<vmem>>, vector<1x128xf32>
      %14 = vector.broadcast %13 : vector<1x128xf32> to vector<8x128xf32>
      %15 = arith.addf %12, %14 : vector<8x128xf32>
      %cst_14 = arith.constant 5.000000e-01 : f32
      %16 = vector.broadcast %cst_14 : f32 to vector<8x128xf32>
      %17 = arith.mulf %16, %15 : vector<8x128xf32>
      %cst_15 = arith.constant 0.707106769 : f32
      %18 = vector.broadcast %cst_15 : f32 to vector<8x128xf32>
      %19 = arith.mulf %15, %18 : vector<8x128xf32>
      %20 = math.erf %19 : vector<8x128xf32>
      %cst_16 = arith.constant 1.000000e+00 : f32
      %21 = vector.broadcast %cst_16 : f32 to vector<8x128xf32>
      %22 = arith.addf %21, %20 : vector<8x128xf32>
      %23 = arith.mulf %17, %22 : vector<8x128xf32>
      %c0_17 = arith.constant 0 : index
      %c0_18 = arith.constant 0 : index
      %24 = vector.load %arg6[%c0_17, %c0_18] : memref<8x128xf32, #tpu.memory_space<vmem>>, vector<8x128xf32>
      tpu.vector_store %arg6[%c0_17, %c0_18], %23 {strides = array<i32>} : memref<8x128xf32, #tpu.memory_space<vmem>>, vector<8x128xf32>,
    } else {
    }
    return
  }
  func.func @transform_0(%arg0: i32, %arg1: i32, %arg2: i32) -> (i32, i32) {
    %c0_i32 = arith.constant 0 : i32
    return %arg0, %arg2 : i32, i32
  }
  func.func @transform_1(%arg0: i32, %arg1: i32, %arg2: i32) -> (i32, i32) {
    %c0_i32 = arith.constant 0 : i32
    return %arg1, %arg2 : i32, i32
  }
  func.func @transform_2(%arg0: i32, %arg1: i32, %arg2: i32) -> (i32, i32) {
    %c0_i32 = arith.constant 0 : i32
    %c0_i32_0 = arith.constant 0 : i32
    return %c0_i32, %arg1 : i32, i32
  }
  func.func @transform_3(%arg0: i32, %arg1: i32, %arg2: i32) -> (i32, i32) {
    %c0_i32 = arith.constant 0 : i32
    return %arg0, %arg1 : i32, i32
  }
}

</mosaic_0001>

<bundles_post_ra>
// kernel: tpu_custom_call.1
= control target key start
LH: loop header
LB: loop body
LE: loop exit
PB: predicated region body
PF: predicated region fallthrough
CT: control target
= control target key end

     0   :  { %8 = vsyncpa [#allocation4], 0  ;;  %s337_s0 = inlined_call_operand.hbm [shape: f32[8,128], index: 0, kind: input, shape index: {}]   ;;  %s338_s1 = inlined_call_operand.hbm [shape: f32[128,128], index: 1, kind: input, shape index: {}]   ;;  %s339_s2 = inlined_call_operand.vmem [shape: f32[1,128], index: 2, kind: input, shape index: {}]   ;;  %s340_s3 = inlined_call_operand.hbm [shape: f32[8,128], index: 3, kind: output, shape index: {}]  }
   0x1   :  { %9 = vsyncpa [#allocation7], 0 }
   0x2   :  { %10 = vsyncpa [#allocation5], 0  ;;  %s298_s12 = smov [#allocation3]   ;;  %s299_s14 = smov [#allocation6]  }
   0x3   :  { %s17_s13 = sshll.u32 %s298_s12, 4  ;;  %s26_s15 = sshll.u32 %s299_s14, 4  ;;  %s18_s13 = int_to_ptr.vmem [resolvable:$true] %s17_s13  ;;  %s27_s15 = int_to_ptr.vmem [resolvable:$true] %s26_s15 }
   0x4   :  { %s240_s16 = scalar_lea.vmem %s18_s13, 128  ;;  %p245_p1 = scmp.lt.s32.totalorder %s18_s13, %s18_s13 }
   0x5   :  { %p241_p0 = scmp.ne.s32.totalorder %s18_s13, %s240_s16  ;;  %p246_p2 = scmp.lt.s32.totalorder %s240_s16, %s240_s16 }
   0x7   :  { %p247_p3 = por %p246_p2, %p245_p1 }
   0x9   :  { %p248_p4 = pnand %p247_p3, %p241_p0 }
   0xb   :  { %251 = shalt.err (!%p248_p4)
}
   0xc   :  { %20 = dma.hbm_to_vmem [thread:$0]  %s337_s0, 128, %s18_s13, [#allocation4]  }
   0xd   :  { %s260_s19 = scalar_lea.vmem %s27_s15, 2048  ;;  %p265_p6 = scmp.lt.s32.totalorder %s27_s15, %s27_s15 }
   0xe   :  { %p261_p5 = scmp.ne.s32.totalorder %s27_s15, %s260_s19  ;;  %p266_p7 = scmp.lt.s32.totalorder %s260_s19, %s260_s19 }
  0x10   :  { %p267_p8 = por %p266_p7, %p265_p6 }
  0x12   :  { %p268_p9 = pnand %p267_p8, %p261_p5 }
  0x14   :  { %271 = shalt.err (!%p268_p9)
}
  0x15   :  { %s300_s20 = smov 128   ;;  %s301_s21 = smov 8  }
  0x16   :  { %32 = dma.hbm_to_vmem [thread:$0]  %s338_s1, 2048, %s27_s15, [#allocation7], %s300_s20, %s300_s20, %s301_s21  }
  0x17   :  { %292 = dma.done.wait [#allocation4], 128  }
  0x18   :  { %293 = vsyncadd [#allocation4], 4294967168 }
  0x19   :  { %294 = dma.done.wait [#allocation7], 2048  }
  0x1a   :  { %295 = vsyncadd [#allocation7], 4294965248  ;;  %v302_v0 = vmov 0.0   ;;  %vm303_vm0 = vmmov 0   ;;  %v63_v1 = vld [vmem:[#allocation6 + $0x78] sm:$0xff]  ;;  %v62_v2 = vld [vmem:[#allocation6 + $0x70] sm:$0xff] }
  0x1b   :  { %188 = vmatprep.subr.mxu0 %v302_v0  ;;  %220 = vmatprep.mubr.msk.f32.mxu0 %vm303_vm0, %v302_v0  ;;  %v61_v3 = vld [vmem:[#allocation6 + $0x68] sm:$0xff]  ;;  %v60_v4 = vld [vmem:[#allocation6 + $0x60] sm:$0xff]  ;;  %v59_v5 = vld [vmem:[#allocation6 + $0x58] sm:$0xff]  ;;  %s304_s24 = smov [#allocation8]  }
  0x1c   :  { %189 = vmatpush3.xpose.msra.mxu0 %v63_v1  ;;  %v58_v6 = vld [vmem:[#allocation6 + $0x50] sm:$0xff]  ;;  %v57_v7 = vld [vmem:[#allocation6 + $0x48] sm:$0xff]  ;;  %v56_v8 = vld [vmem:[#allocation6 + $0x40] sm:$0xff]  ;;  %s160_s25 = sshll.u32 %s304_s24, 4  ;;  %s161_s25 = int_to_ptr.vmem [resolvable:$true] %s160_s25 }
  0x1d   :  { %190 = vmatprep.subr.mxu0 %v302_v0  ;;  %v55_v9 = vld [vmem:[#allocation6 + $0x38] sm:$0xff]  ;;  %v54_v10 = vld [vmem:[#allocation6 + $0x30] sm:$0xff]  ;;  %v53_v11 = vld [vmem:[#allocation6 + $0x28] sm:$0xff]  ;;  %s272_s26 = scalar_lea.vmem %s161_s25, 128  ;;  %p277_p11 = scmp.lt.s32.totalorder %s161_s25, %s161_s25 }
  0x1e   :  { %v52_v12 = vld [vmem:[#allocation6 + $0x20] sm:$0xff]  ;;  %v51_v13 = vld [vmem:[#allocation6 + $0x18] sm:$0xff]  ;;  %v50_v14 = vld [vmem:[#allocation6 + $0x10] sm:$0xff]  ;;  %p273_p10 = scmp.ne.s32.totalorder %s161_s25, %s272_s26  ;;  %p278_p12 = scmp.lt.s32.totalorder %s272_s26, %s272_s26 }
  0x1f   :  { %v49_v15 = vld [vmem:[#allocation6 + $0x8] sm:$0xff]  ;;  %v48_v16 = vld [vmem:[#allocation6] sm:$0xff]  ;;  %v47_v17 = vld [vmem:[#allocation3] sm:$0xff] }
  0x20   :  { %191 = vmatpush3.xpose.msra.mxu0 %v62_v2  ;;  %v170_v18 = vld [vmem:[%s339_s2] ss:$0 sm:$0xff]  ;;  %p279_p13 = por %p278_p12, %p277_p11 }
  0x21   :  { %192 = vmatprep.subr.mxu0 %v302_v0 }
  0x22   :  { %p280_p0 = pnand %p279_p13, %p273_p10 }
  0x24   :  { %193 = vmatpush3.xpose.msra.mxu0 %v61_v3 }
  0x25   :  { %194 = vmatprep.subr.mxu0 %v302_v0 }
  0x28   :  { %195 = vmatpush3.xpose.msra.mxu0 %v60_v4 }
  0x29   :  { %196 = vmatprep.subr.mxu0 %v302_v0 }
  0x2c   :  { %197 = vmatpush3.xpose.msra.mxu0 %v59_v5 }
  0x2d   :  { %198 = vmatprep.subr.mxu0 %v302_v0 }
  0x30   :  { %199 = vmatpush3.xpose.msra.mxu0 %v58_v6 }
  0x31   :  { %200 = vmatprep.subr.mxu0 %v302_v0 }
  0x34   :  { %201 = vmatpush3.xpose.msra.mxu0 %v57_v7 }
  0x35   :  { %202 = vmatprep.subr.mxu0 %v302_v0 }
  0x38   :  { %203 = vmatpush3.xpose.msra.mxu0 %v56_v8 }
  0x39   :  { %204 = vmatprep.subr.mxu0 %v302_v0 }
  0x3c   :  { %205 = vmatpush3.xpose.msra.mxu0 %v55_v9 }
  0x3d   :  { %206 = vmatprep.subr.mxu0 %v302_v0 }
  0x40   :  { %207 = vmatpush3.xpose.msra.mxu0 %v54_v10 }
  0x41   :  { %208 = vmatprep.subr.mxu0 %v302_v0 }
  0x44   :  { %209 = vmatpush3.xpose.msra.mxu0 %v53_v11 }
  0x45   :  { %210 = vmatprep.subr.mxu0 %v302_v0 }
  0x48   :  { %211 = vmatpush3.xpose.msra.mxu0 %v52_v12 }
  0x49   :  { %212 = vmatprep.subr.mxu0 %v302_v0 }
  0x4c   :  { %213 = vmatpush3.xpose.msra.mxu0 %v51_v13 }
  0x4d   :  { %214 = vmatprep.subr.mxu0 %v302_v0 }
  0x50   :  { %215 = vmatpush3.xpose.msra.mxu0 %v50_v14 }
  0x51   :  { %216 = vmatprep.subr.mxu0 %v302_v0 }
  0x54   :  { %217 = vmatpush3.xpose.msra.mxu0 %v49_v15 }
  0x55   :  { %218 = vmatprep.subr.mxu0 %v302_v0 }
  0x58   :  { %219 = vmatpush3.xpose.msra.mxu0 %v48_v16 }
  0x5b   :  { %221 = vmatmul.mubr.f32.vlgmr.msra.gmra.mxu0 %v47_v17 }
 0x11b   :  { %v130_v19 = vpop.f32.mrf.mxu0 }
 0x11c   :  { %v147_v20 = vadd.f32 %v170_v18, %v130_v19 }
 0x11d   :  { %v222_v21 = vpop.f32.mrf.mxu0 }
 0x11e   :  { %v149_v22 = vmul.f32 0.70710677, %v147_v20  ;;  %v148_v24 = vmul.f32 0.5, %v147_v20 }
 0x120   :  { %230 = verf.f32 %v149_v22 }
 0x12d   :  { %v231_v23 = vpop.eup %230 }
 0x12e   :  { %v151_v25 = vadd.f32 1.0, %v231_v23 }
 0x130   :  { %v152_v26 = vmul.f32 %v151_v25, %v148_v24 }
 0x132   :  { %153 = vst [vmem:[#allocation8] sm:$0xff] %v152_v26 }
 0x133   :  { %283 = shalt.err (!%p280_p0)
}
 0x134   :  { %163 = dma.vmem_to_hbm [thread:$0]  %s161_s25, 128, %s340_s3, [#allocation5]  }
 0x135   :  { %296 = dma.done.wait [#allocation5], 128  }
 0x136   :  { %297 = vsyncadd [#allocation5], 4294967168 }
 0x137   :  { %167 = vsyncpa [#allocation4], 1 }
 0x138   :  { %168 = vsyncpa [#allocation7], 1 }
 0x139   :  { %169 = vsyncpa [#allocation5], 1 }

</bundles_post_ra>
